<compile_context>
chip_gen: v7x
topology: tpu7x:2x2x1
jax: 0.10.0
libtpu: 0.0.40
codegen_flags: <defaults>
</compile_context>

<pallas_src>
import math
import functools

import jax
import jax.numpy as jnp
from jax.experimental import pallas as pl
from jax.experimental.pallas import tpu as pltpu


def _round_up(n, m):
    return (n + m - 1) // m * m


def _l2_normalize_rows_kernel(w_ref, out_ref):
    """Row-wise L2 normalization of a [TN, D] weight tile (eps = 1e-12 on the norm)."""
    w = w_ref[...].astype(jnp.float32)
    inv = jax.lax.rsqrt(jnp.maximum(jnp.sum(w * w, axis=-1, keepdims=True), 1e-24))
    out_ref[...] = (w * inv).astype(out_ref.dtype)


def _arcface_tile_kernel(x_ref, wn_ref, y_ref, out_ref, *, s, cos_m, sin_m,
                         compute_dtype):
    j = pl.program_id(1)                 # class-tile index
    tn = out_ref.shape[1]

    # Normalize the x tile (f32 VPU + one EUP rsqrt per row), cast at the dot.
    x = x_ref[...].astype(jnp.float32)                       # [TM, D]
    inv = jax.lax.rsqrt(jnp.maximum(jnp.sum(x * x, axis=-1, keepdims=True), 1e-24))
    xn = (x * inv).astype(compute_dtype)                      # [TM, D]

    wn = wn_ref[...]                                          # [TN, D], pre-normalized

    # logits = xn @ wn^T via dot_general (contract dim 1 of both) -> MXU, no XLU transpose.
    logits = jax.lax.dot_general(
        xn, wn,
        dimension_numbers=(((1,), (1,)), ((), ())),
        preferred_element_type=jnp.float32)                   # [TM, TN] f32

    # One-hot against GLOBAL class ids (class dim is tiled).
    y = y_ref[...]                                            # [TM, 1] int32
    class_ids = j * tn + jax.lax.broadcasted_iota(jnp.int32, logits.shape, 1)
    one_hot = class_ids == y                                  # [TM, TN] bool

    # Margin math only on the target logit per row ([TM,1]), not the full tile.
    t = jnp.sum(jnp.where(one_hot, logits, 0.0), axis=-1, keepdims=True)
    t = jnp.clip(t, -1.0 + 1e-7, 1.0 - 1e-7)
    corrected = t * cos_m - jnp.sqrt(1.0 - t * t) * sin_m      # [TM, 1]

    out_ref[...] = (jnp.where(one_hot, corrected, logits) * s).astype(out_ref.dtype)


def arcface_forward(x, W, y, *, s=30.0, m=0.35,
                    compute_dtype=jnp.float32, tm=256, tn=512):
    """ArcFace forward.

    x: [B, in_features] f32, W: [out_features, in_features] f32, y: [B] int labels.
    compute_dtype: MXU input dtype (use jnp.bfloat16 on v6e/v7x for throughput).
    Returns [B, out_features] f32.
    """
    B, D = x.shape
    C, D2 = W.shape
    assert D == D2, "in_features mismatch"

    # Tile sizes: 8/128-aligned, capped to keep double-buffered tiles well under
    # v7x's 32 MiB scoped-VMEM default.
    TM = min(int(tm), _round_up(B, 8))
    TN = min(int(tn), _round_up(C, 128))
    Bp = _round_up(B, TM)
    Cp = _round_up(C, TN)

    x_p = x if Bp == B else jnp.pad(x, ((0, Bp - B), (0, 0)))
    W_p = W if Cp == C else jnp.pad(W, ((0, Cp - C), (0, 0)))
    y_p = y.astype(jnp.int32).reshape(-1, 1)
    if Bp != B:
        y_p = jnp.pad(y_p, ((0, Bp - B), (0, 0)))

    # ---- Pass 1: normalize W rows once, emit in the MXU compute dtype. ----
    wn = pl.pallas_call(
        _l2_normalize_rows_kernel,
        out_shape=jax.ShapeDtypeStruct((Cp, D), compute_dtype),
        grid=(Cp // TN,),
        in_specs=[pl.BlockSpec((TN, D), lambda j: (j, 0))],
        out_specs=pl.BlockSpec((TN, D), lambda j: (j, 0)),
        compiler_params=pltpu.CompilerParams(dimension_semantics=("parallel",)),
    )(W_p)

    # ---- Pass 2: tiled logits + margin blend. ----
    w_itemsize = jnp.dtype(compute_dtype).itemsize
    vmem_bytes = 2 * (TM * D * 4 + TN * D * w_itemsize + TM * TN * 4 + TM * 4) + (2 << 20)
    vmem_limit = int(min(max(vmem_bytes, 32 << 20), 64 << 20))

    n_batch_tiles = Bp // TM
    cost = pl.CostEstimate(
        flops=2 * Bp * Cp * D,
        transcendentals=2 * Bp,  # rsqrt per row + sqrt on the target logit per row
        bytes_accessed=(4 * Bp * D + w_itemsize * Cp * D * n_batch_tiles
                        + 4 * Bp * Cp + 4 * Bp),
    )

    kernel = functools.partial(
        _arcface_tile_kernel,
        s=float(s), cos_m=math.cos(m), sin_m=math.sin(m),
        compute_dtype=compute_dtype)

    out = pl.pallas_call(
        kernel,
        out_shape=jax.ShapeDtypeStruct((Bp, Cp), jnp.float32),
        grid_spec=pltpu.PrefetchScalarGridSpec(
            num_scalar_prefetch=0,
            grid=(Bp // TM, Cp // TN),
            in_specs=[
                pl.BlockSpec((TM, D), lambda i, j: (i, 0)),   # x tile
                pl.BlockSpec((TN, D), lambda i, j: (j, 0)),   # normalized W tile
                pl.BlockSpec((TM, 1), lambda i, j: (i, 0)),   # labels
            ],
            out_specs=pl.BlockSpec((TM, TN), lambda i, j: (i, j)),
        ),
        compiler_params=pltpu.CompilerParams(
            dimension_semantics=("parallel", "parallel"),
            vmem_limit_bytes=vmem_limit,
        ),
        cost_estimate=cost,
    )(x_p, wn, y_p)

    if Bp != B or Cp != C:
        out = out[:B, :C]
    return out


if __name__ == "__main__":
    # Small shapes consistent with the module: batch=8, in_features=32,
    # out_features=128 classes; args.s -> 30.0, margin m=0.35.
    B, IN_FEATURES, OUT_FEATURES = 8, 32, 128
    S, M = 30.0, 0.35

    key = jax.random.PRNGKey(0)
    kx, kw, ky = jax.random.split(key, 3)

    x = jax.random.normal(kx, (B, IN_FEATURES), dtype=jnp.float32)

    # Deterministic Xavier-uniform init for W [out_features, in_features].
    bound = math.sqrt(6.0 / (IN_FEATURES + OUT_FEATURES))
    W = jax.random.uniform(kw, (OUT_FEATURES, IN_FEATURES), dtype=jnp.float32,
                           minval=-bound, maxval=bound)

    y = jax.random.randint(ky, (B,), 0, OUT_FEATURES, dtype=jnp.int32)

    # f32 MXU-input path (tight accuracy check).
    out = jax.block_until_ready(
        arcface_forward(x, W, y, s=S, m=M, compute_dtype=jnp.float32))

    # Pure-JAX reference of the same semantics.
    xn = x / jnp.maximum(jnp.linalg.norm(x, axis=1, keepdims=True), 1e-12)
    wn = W / jnp.maximum(jnp.linalg.norm(W, axis=1, keepdims=True), 1e-12)
    logits = xn @ wn.T
    theta = jnp.arccos(jnp.clip(logits, -1.0 + 1e-7, 1.0 - 1e-7))
    target = jnp.cos(theta + M)
    one_hot = jax.nn.one_hot(y, OUT_FEATURES, dtype=jnp.float32)
    ref = (logits * (1.0 - one_hot) + target * one_hot) * S

    assert out.shape == (B, OUT_FEATURES)
    assert jnp.allclose(out, ref, atol=1e-4, rtol=1e-4)

    # bf16 MXU-input path (production setting for v6e/v7x): looser tolerance.
    out_bf16 = jax.block_until_ready(
        arcface_forward(x, W, y, s=S, m=M, compute_dtype=jnp.bfloat16))
    assert out_bf16.shape == (B, OUT_FEATURES)
    assert jnp.allclose(out_bf16, ref, atol=0.5, rtol=0.05)

    print("KERNEL_OK")
</pallas_src>

<mosaic_0001>
module attributes {stable_mosaic.version = 11 : i64} {
  func.func @_l2_normalize_rows_kernel(%arg0: i32, %arg1: memref<128x32xf32, #tpu.memory_space<vmem>>, %arg2: memref<128x32xf32, #tpu.memory_space<vmem>>) attributes {dimension_semantics = [#tpu.dimension_semantics<parallel>], iteration_bounds = array<i64: 1>, scalar_prefetch = 0 : i64, scratch_operands = 0 : i64, tpu.core_type = #tpu.core_type<tc>, window_params = [{transform_indices = @transform_0, window_bounds = array<i64: 128, 32>}, {transform_indices = @transform_1, window_bounds = array<i64: 128, 32>}]} {
    %c0 = arith.constant 0 : index
    %c0_0 = arith.constant 0 : index
    %0 = vector.load %arg1[%c0, %c0_0] : memref<128x32xf32, #tpu.memory_space<vmem>>, vector<128x32xf32>
    %1 = arith.mulf %0, %0 : vector<128x32xf32>
    %cst = arith.constant dense<0.000000e+00> : vector<128xf32>
    %2 = vector.multi_reduction <add>, %1, %cst [1] : vector<128x32xf32> to vector<128xf32>
    %3 = vector.shape_cast %2 : vector<128xf32> to vector<128x1xf32>
    %cst_1 = arith.constant 1.000000e-24 : f32
    %4 = vector.broadcast %cst_1 : f32 to vector<128x1xf32>
    %5 = arith.maximumf %3, %4 : vector<128x1xf32>
    %6 = math.rsqrt %5 : vector<128x1xf32>
    %7 = vector.broadcast %6 : vector<128x1xf32> to vector<128x32xf32>
    %8 = arith.mulf %0, %7 : vector<128x32xf32>
    %c0_2 = arith.constant 0 : index
    %c0_3 = arith.constant 0 : index
    %9 = vector.load %arg2[%c0_2, %c0_3] : memref<128x32xf32, #tpu.memory_space<vmem>>, vector<128x32xf32>
    tpu.vector_store %arg2[%c0_2, %c0_3], %8 {strides = array<i32>} : memref<128x32xf32, #tpu.memory_space<vmem>>, vector<128x32xf32>,
    return
  }
  func.func @transform_0(%arg0: i32) -> (i32, i32) {
    %c0_i32 = arith.constant 0 : i32
    %c0_i32_0 = arith.constant 0 : i32
    return %arg0, %c0_i32 : i32, i32
  }
  func.func @transform_1(%arg0: i32) -> (i32, i32) {
    %c0_i32 = arith.constant 0 : i32
    %c0_i32_0 = arith.constant 0 : i32
    return %arg0, %c0_i32 : i32, i32
  }
}

</mosaic_0001>

<bundles_post_ra>
// kernel: tpu_custom_call.1
= control target key start
LH: loop header
LB: loop body
LE: loop exit
PB: predicated region body
PF: predicated region fallthrough
CT: control target
= control target key end

     0   :  { %vm40_vm0 = vcmask 261120   ;;  %s407_s0 = inlined_call_operand.vmem [shape: f32[128,32], index: 0, kind: input, shape index: {}]   ;;  %s408_s1 = inlined_call_operand.vmem [shape: f32[128,32], index: 1, kind: output, shape index: {}]  }
   0x1   :  { %v202_v0 = vld [vmem:[%s407_s0 + $0x10] sm:$0xff]  ;;  %v207_v1 = vld [vmem:[%s407_s0] sm:$0xff]  ;;  %v212_v2 = vld [vmem:[%s407_s0 + $0x18] sm:$0xff] }
   0x2   :  { %v26_v3 = vmul.f32 %v202_v0, %v202_v0  ;;  %v24_v4 = vmul.f32 %v207_v1, %v207_v1  ;;  %v27_v5 = vmul.f32 %v212_v2, %v212_v2  ;;  %v223_v6 = vld [vmem:[%s407_s0 + $0x8] sm:$0xff]  ;;  %v235_v9 = vld [vmem:[%s407_s0 + $0x20] sm:$0xff]  ;;  %v248_v16 = vld [vmem:[%s407_s0 + $0x38] sm:$0xff] }
   0x3   :  { %v25_v7 = vmul.f32 %v223_v6, %v223_v6  ;;  %v230_v8 = vld [vmem:[%s407_s0 + $0x28] sm:$0xff]  ;;  %v28_v15 = vmul.f32 %v235_v9, %v235_v9  ;;  %v253_v17 = vld [vmem:[%s407_s0 + $0x30] sm:$0xff]  ;;  %v31_v20 = vmul.f32 %v248_v16, %v248_v16  ;;  %v269_v23 = vld [vmem:[%s407_s0 + $0x40] sm:$0xff] }
   0x4   :  { %v47_v10 = vsel %vm40_vm0, %v26_v3, 0.0  ;;  %v41_v11 = vsel %vm40_vm0, %v24_v4, 0.0  ;;  %v50_v12 = vsel %vm40_vm0, %v27_v5, 0.0  ;;  %v29_v14 = vmul.f32 %v230_v8, %v230_v8  ;;  %v264_v22 = vld [vmem:[%s407_s0 + $0x48] sm:$0xff]  ;;  %v280_v28 = vld [vmem:[%s407_s0 + $0x58] sm:$0xff]  ;;  %v285_v29 = vld [vmem:[%s407_s0 + $0x50] sm:$0xff] }
   0x5   :  { %48 = vadd.xlane.f32.xlu1 %v47_v10  ;;  %42 = vadd.xlane.f32.xlu0 %v41_v11  ;;  %v44_v13 = vsel %vm40_vm0, %v25_v7, 0.0  ;;  %v53_v19 = vsel %vm40_vm0, %v28_v15, 0.0  ;;  %v30_v21 = vmul.f32 %v253_v17, %v253_v17  ;;  %v62_v24 = vsel %vm40_vm0, %v31_v20, 0.0  ;;  %v296_v34 = vld [vmem:[%s407_s0 + $0x68] sm:$0xff]  ;;  %v301_v35 = vld [vmem:[%s407_s0 + $0x60] sm:$0xff]  ;;  %v312_v40 = vld [vmem:[%s407_s0 + $0x78] sm:$0xff] }
   0x6   :  { %v56_v18 = vsel %vm40_vm0, %v29_v14, 0.0  ;;  %v33_v26 = vmul.f32 %v264_v22, %v264_v22  ;;  %v32_v27 = vmul.f32 %v269_v23, %v269_v23  ;;  %v35_v32 = vmul.f32 %v280_v28, %v280_v28  ;;  %v317_v41 = vld [vmem:[%s407_s0 + $0x70] sm:$0xff] }
   0x7   :  { %v59_v25 = vsel %vm40_vm0, %v30_v21, 0.0  ;;  %v34_v33 = vmul.f32 %v285_v29, %v285_v29  ;;  %v37_v38 = vmul.f32 %v296_v34, %v296_v34  ;;  %v36_v39 = vmul.f32 %v301_v35, %v301_v35 }
   0x8   :  { %v68_v30 = vsel %vm40_vm0, %v33_v26, 0.0  ;;  %v65_v31 = vsel %vm40_vm0, %v32_v27, 0.0  ;;  %v74_v36 = vsel %vm40_vm0, %v35_v32, 0.0  ;;  %v39_v44 = vmul.f32 %v312_v40, %v312_v40 }
   0x9   :  { %51 = vadd.xlane.f32.xlu1 %v50_v12  ;;  %45 = vadd.xlane.f32.xlu0 %v44_v13  ;;  %v71_v37 = vsel %vm40_vm0, %v34_v33, 0.0  ;;  %v80_v42 = vsel %vm40_vm0, %v37_v38, 0.0  ;;  %v77_v43 = vsel %vm40_vm0, %v36_v39, 0.0  ;;  %v38_v45 = vmul.f32 %v317_v41, %v317_v41 }
   0xa   :  { %v86_v46 = vsel %vm40_vm0, %v39_v44, 0.0 }
   0xb   :  { %v83_v47 = vsel %vm40_vm0, %v38_v45, 0.0 }
   0xd   :  { %57 = vadd.xlane.f32.xlu1 %v56_v18  ;;  %54 = vadd.xlane.f32.xlu0 %v53_v19 }
  0x11   :  { %63 = vadd.xlane.f32.xlu1 %v62_v24  ;;  %60 = vadd.xlane.f32.xlu0 %v59_v25 }
  0x15   :  { %69 = vadd.xlane.f32.xlu1 %v68_v30  ;;  %66 = vadd.xlane.f32.xlu0 %v65_v31 }
  0x19   :  { %75 = vadd.xlane.f32.xlu1 %v74_v36  ;;  %72 = vadd.xlane.f32.xlu0 %v71_v37 }
  0x1d   :  { %81 = vadd.xlane.f32.xlu1 %v80_v42  ;;  %78 = vadd.xlane.f32.xlu0 %v77_v43 }
  0x21   :  { %87 = vadd.xlane.f32.xlu1 %v86_v46  ;;  %84 = vadd.xlane.f32.xlu0 %v83_v47 }
  0x92   :  { %v49_v48 = vpop.xlane.xlu1 %48  ;;  %v43_v49 = vpop.xlane.xlu0 %42 }
  0x93   :  { %v91_v50 = vmax.f32 %v49_v48, 1e-24  ;;  %v89_v51 = vmax.f32 %v43_v49, 1e-24 }
  0x95   :  { %157 = vrsqrt.f32 %v91_v50 }
  0x96   :  { %159 = vrsqrt.f32 %v89_v51  ;;  %v52_v52 = vpop.xlane.xlu1 %51  ;;  %v46_v53 = vpop.xlane.xlu0 %45 }
  0x97   :  { %v92_v54 = vmax.f32 %v52_v52, 1e-24  ;;  %v90_v55 = vmax.f32 %v46_v53, 1e-24 }
  0x99   :  { %161 = vrsqrt.f32 %v92_v54 }
  0x9a   :  { %163 = vrsqrt.f32 %v90_v55  ;;  %v58_v56 = vpop.xlane.xlu1 %57  ;;  %v55_v57 = vpop.xlane.xlu0 %54 }
  0x9b   :  { %v94_v58 = vmax.f32 %v58_v56, 1e-24  ;;  %v93_v59 = vmax.f32 %v55_v57, 1e-24 }
  0x9d   :  { %165 = vrsqrt.f32 %v94_v58 }
  0x9e   :  { %167 = vrsqrt.f32 %v93_v59  ;;  %v64_v60 = vpop.xlane.xlu1 %63  ;;  %v61_v61 = vpop.xlane.xlu0 %60 }
  0x9f   :  { %v158_v62 = vpop.eup %157  ;;  %v96_v63 = vmax.f32 %v64_v60, 1e-24  ;;  %v95_v3 = vmax.f32 %v61_v61, 1e-24 }
  0xa0   :  { %v160_v4 = vpop.eup %159  ;;  %v123_v5 = vmul.f32 %v158_v62, %v202_v0 }
  0xa1   :  { %v121_v7 = vmul.f32 %v160_v4, %v207_v1  ;;  %169 = vrsqrt.f32 %v96_v63 }
  0xa2   :  { %139 = vst.msk [vmem:[%s408_s1 + $0x10] sm:$0xff] %vm40_vm0, %v123_v5  ;;  %171 = vrsqrt.f32 %v95_v3  ;;  %v70_v10 = vpop.xlane.xlu1 %69  ;;  %v67_v11 = vpop.xlane.xlu0 %66 }
  0xa3   :  { %v162_v12 = vpop.eup %161  ;;  %137 = vst.msk [vmem:[%s408_s1] sm:$0xff] %vm40_vm0, %v121_v7  ;;  %v98_v13 = vmax.f32 %v70_v10, 1e-24  ;;  %v97_v14 = vmax.f32 %v67_v11, 1e-24 }
  0xa4   :  { %v164_v0 = vpop.eup %163  ;;  %v124_v1 = vmul.f32 %v162_v12, %v212_v2 }
  0xa5   :  { %v122_v15 = vmul.f32 %v164_v0, %v223_v6  ;;  %173 = vrsqrt.f32 %v98_v13 }
  0xa6   :  { %140 = vst.msk [vmem:[%s408_s1 + $0x18] sm:$0xff] %vm40_vm0, %v124_v1  ;;  %175 = vrsqrt.f32 %v97_v14  ;;  %v76_v18 = vpop.xlane.xlu1 %75  ;;  %v73_v19 = vpop.xlane.xlu0 %72 }
  0xa7   :  { %v166_v20 = vpop.eup %165  ;;  %138 = vst.msk [vmem:[%s408_s1 + $0x8] sm:$0xff] %vm40_vm0, %v122_v15  ;;  %v100_v21 = vmax.f32 %v76_v18, 1e-24  ;;  %v99_v24 = vmax.f32 %v73_v19, 1e-24 }
  0xa8   :  { %v168_v2 = vpop.eup %167  ;;  %v126_v6 = vmul.f32 %v166_v20, %v230_v8 }
  0xa9   :  { %v125_v25 = vmul.f32 %v168_v2, %v235_v9  ;;  %177 = vrsqrt.f32 %v100_v21 }
  0xaa   :  { %142 = vst.msk [vmem:[%s408_s1 + $0x28] sm:$0xff] %vm40_vm0, %v126_v6  ;;  %179 = vrsqrt.f32 %v99_v24  ;;  %v82_v26 = vpop.xlane.xlu1 %81  ;;  %v79_v27 = vpop.xlane.xlu0 %78 }
  0xab   :  { %v170_v30 = vpop.eup %169  ;;  %141 = vst.msk [vmem:[%s408_s1 + $0x20] sm:$0xff] %vm40_vm0, %v125_v25  ;;  %v102_v31 = vmax.f32 %v82_v26, 1e-24  ;;  %v101_v32 = vmax.f32 %v79_v27, 1e-24 }
  0xac   :  { %v172_v8 = vpop.eup %171  ;;  %v128_v9 = vmul.f32 %v170_v30, %v248_v16 }
  0xad   :  { %v127_v33 = vmul.f32 %v172_v8, %v253_v17  ;;  %181 = vrsqrt.f32 %v102_v31 }
  0xae   :  { %144 = vst.msk [vmem:[%s408_s1 + $0x38] sm:$0xff] %vm40_vm0, %v128_v9  ;;  %183 = vrsqrt.f32 %v101_v32  ;;  %v88_v36 = vpop.xlane.xlu1 %87  ;;  %v85_v37 = vpop.xlane.xlu0 %84 }
  0xaf   :  { %v174_v38 = vpop.eup %173  ;;  %143 = vst.msk [vmem:[%s408_s1 + $0x30] sm:$0xff] %vm40_vm0, %v127_v33  ;;  %v104_v39 = vmax.f32 %v88_v36, 1e-24  ;;  %v103_v42 = vmax.f32 %v85_v37, 1e-24 }
  0xb0   :  { %v176_v16 = vpop.eup %175  ;;  %v130_v17 = vmul.f32 %v174_v38, %v264_v22 }
  0xb1   :  { %v129_v43 = vmul.f32 %v176_v16, %v269_v23  ;;  %185 = vrsqrt.f32 %v104_v39 }
  0xb2   :  { %146 = vst.msk [vmem:[%s408_s1 + $0x48] sm:$0xff] %vm40_vm0, %v130_v17  ;;  %187 = vrsqrt.f32 %v103_v42 }
  0xb3   :  { %v178_v44 = vpop.eup %177  ;;  %145 = vst.msk [vmem:[%s408_s1 + $0x40] sm:$0xff] %vm40_vm0, %v129_v43 }
  0xb4   :  { %v180_v45 = vpop.eup %179  ;;  %v132_v46 = vmul.f32 %v178_v44, %v280_v28 }
  0xb5   :  { %v131_v22 = vmul.f32 %v180_v45, %v285_v29 }
  0xb6   :  { %148 = vst.msk [vmem:[%s408_s1 + $0x58] sm:$0xff] %vm40_vm0, %v132_v46 }
  0xb7   :  { %v182_v23 = vpop.eup %181  ;;  %147 = vst.msk [vmem:[%s408_s1 + $0x50] sm:$0xff] %vm40_vm0, %v131_v22 }
  0xb8   :  { %v184_v47 = vpop.eup %183  ;;  %v134_v48 = vmul.f32 %v182_v23, %v296_v34 }
  0xb9   :  { %v133_v49 = vmul.f32 %v184_v47, %v301_v35 }
  0xba   :  { %150 = vst.msk [vmem:[%s408_s1 + $0x68] sm:$0xff] %vm40_vm0, %v134_v48 }
  0xbb   :  { %v186_v28 = vpop.eup %185  ;;  %149 = vst.msk [vmem:[%s408_s1 + $0x60] sm:$0xff] %vm40_vm0, %v133_v49 }
  0xbc   :  { %v188_v29 = vpop.eup %187  ;;  %v136_v50 = vmul.f32 %v186_v28, %v312_v40 }
  0xbd   :  { %v135_v51 = vmul.f32 %v188_v29, %v317_v41 }
  0xbe   :  { %152 = vst.msk [vmem:[%s408_s1 + $0x78] sm:$0xff] %vm40_vm0, %v136_v50 }
  0xbf   :  { %151 = vst.msk [vmem:[%s408_s1 + $0x70] sm:$0xff] %vm40_vm0, %v135_v51 }

</bundles_post_ra>
